<compile_context>
chip_gen: v6e
topology: v6e:2x2x1
jax: 0.10.0
libtpu: 0.0.40
codegen_flags: <defaults>
</compile_context>

<pallas_src>
import functools

import jax
import jax.numpy as jnp
from jax import lax
from jax.experimental import pallas as pl
from jax.experimental.pallas import tpu as pltpu

EPS = 1e-5
LANE = 128


# ------------------------------ kernel helpers ------------------------------ #

def _rowwise_contract(w, xt):
    """w: [R, C] @ xt: [C, M] -> [R, M]  (time on lanes, f32 accumulate).

    For tiny contraction depths (this module has C = L or C = N, both small)
    the MXU would be <1% utilized and still pay push/pop latency, so unroll
    as VPU broadcast-FMAs; only genuinely deep contractions take the MXU.
    """
    c = w.shape[1]
    if c < 128:
        acc = w[:, 0:1] * xt[0:1, :]
        for i in range(1, c):
            acc = acc + w[:, i:i + 1] * xt[i:i + 1, :]
        return acc
    return jnp.dot(w.astype(jnp.bfloat16), xt.astype(jnp.bfloat16),
                   preferred_element_type=jnp.float32)


def _encode_frames(w_enc, x_lo, x_hi, hop):
    """Conv1d(1, N, L, stride=hop, bias=False) on hop-phase rows.

    x_lo[j, t] = x[t*hop + j],  x_hi[j, t] = x[(t+1)*hop + j]   (j < hop)
    yraw[n, t] = sum_j w[n, j]*x_lo[j, t] + sum_j w[n, hop+j]*x_hi[j, t]
    """
    acc = w_enc[:, 0:1] * x_lo[0:1, :]
    for j in range(1, hop):
        acc = acc + w_enc[:, j:j + 1] * x_lo[j:j + 1, :]
    for j in range(hop):
        acc = acc + w_enc[:, hop + j:hop + j + 1] * x_hi[j:j + 1, :]
    return acc


def _fused_kernel(x_ref, wenc_ref, wdect_ref, gamma_ref, beta_ref, o_ref,
                  sum_ref, sumsq_ref, scale_ref, shift_ref, cache_ref,
                  *, hop, t_out, tp, inv_count, block_b, cache_pass0):
    """grid = (pass, batch-block).  pass 0: global BN statistics (+ VMEM cache
    of encoder activations).  pass 1: BN + ReLU (2x segmentation/over-add
    factor folded in) + ConvTranspose1d + overlap-add, all in VMEM."""
    p = pl.program_id(0)
    bb = pl.program_id(1)

    # lane mask: only frame columns < T_out carry a complete (valid) frame
    col = lax.broadcasted_iota(jnp.int32, (1, tp), 1)
    valid = col < t_out

    @pl.when(jnp.logical_and(p == 0, bb == 0))
    def _init():
        sum_ref[...] = jnp.zeros_like(sum_ref)
        sumsq_ref[...] = jnp.zeros_like(sumsq_ref)
        # defensive init of the parked pass-0 output block (never read; keeps
        # the buffer well-defined regardless of writeback policy).
        o_ref[...] = jnp.zeros(o_ref.shape, o_ref.dtype)

    def encode(i):
        x_lo = x_ref[i]                                       # [hop, Tp]
        # one block to the left: x_hi[:, t] = x_lo[:, t+1]; the wrapped lane
        # lands at column Tp-1 >= T_out and is masked below.
        x_hi = pltpu.roll(x_lo, shift=tp - 1, axis=1)
        y = _encode_frames(wenc_ref[...], x_lo, x_hi, hop)    # [N, Tp]
        return jnp.where(valid, y, 0.0)

    # ---- pass 0: per-channel sum / sum-of-squares over the whole batch ---- #
    @pl.when(p == 0)
    def _pass0():
        # TODO(synk): E[x^2]-E[x]^2 in f32 can lose precision for very long
        # signals / large-mean activations; switch to a per-block centered
        # (Welford-merge) accumulation if that regime matters.
        s = None
        ss = None
        for i in range(block_b):          # trace-time unrolled (block_b small)
            y = encode(i)
            if cache_pass0:
                cache_ref[bb * block_b + i] = y
            si = jnp.sum(y, axis=1, keepdims=True)
            ssi = jnp.sum(y * y, axis=1, keepdims=True)
            s = si if s is None else s + si
            ss = ssi if ss is None else ss + ssi
        sum_ref[...] = sum_ref[...] + s
        sumsq_ref[...] = sumsq_ref[...] + ss

    # ---- pass boundary: finalize BN scale/shift (biased variance = exact
    #      torch train-mode BN), folding in the exact 2x produced by the
    #      segmentation -> overlap-add round trip (2*relu(a) == relu(2*a)). --- #
    @pl.when(jnp.logical_and(p == 1, bb == 0))
    def _finalize():
        mean = sum_ref[...] * inv_count
        var = sumsq_ref[...] * inv_count - mean * mean
        sc = gamma_ref[...] * lax.rsqrt(var + EPS)
        scale_ref[...] = 2.0 * sc
        shift_ref[...] = 2.0 * (beta_ref[...] - mean * sc)

    # ---- pass 1: BN + ReLU + ConvTranspose1d + overlap-add, one store ---- #
    @pl.when(p == 1)
    def _pass1():
        scale = scale_ref[...]
        shift = shift_ref[...]
        for i in range(block_b):          # trace-time unrolled (block_b small)
            y = cache_ref[bb * block_b + i] if cache_pass0 else encode(i)
            z = jnp.where(valid, jnp.maximum(y * scale + shift, 0.0), 0.0)
            ft = _rowwise_contract(wdect_ref[...], z)          # [L, Tp]
            first = ft[0:hop, :]
            # transposed-conv overlap-add: out[:, u] = first[:, u] + second[:, u-1]
            # the wrapped lane 0 of `second` holds ft[:, Tp-1] == 0 (z masked),
            # so this is a single full-width unmasked store, no RMW.
            second = pltpu.roll(ft[hop:, :], shift=1, axis=1)
            o_ref[i] = first + second


# ------------------------------- full forward ------------------------------- #

def encoder_decoder_forward(x, params, L, K, block_b=None):
    """x: [B, 1, T] float32 -> [B, 1, (T_out+1)*(L//2)]  (matches torch forward)."""
    # TODO(synk): torch's _over_add unpacks a 5-D [B,N,K,R,C] tensor but the
    # forward hands it the 4-D segmentation output; we implement the 4-D
    # (speaker-less) overlap-add the forward implies, whose round trip with
    # _Segmentation is exactly 2*y — folded into the BN affine in the kernel.
    del K
    B, _, T = x.shape
    assert L % 2 == 0, "stride L//2 with 50% frame overlap requires even L"
    hop = L // 2
    T_out = (T - L) // hop + 1
    N = params["w_enc"].shape[0]

    Bt = int(min(B, 8)) if block_b is None else int(block_b)
    Bt = max(1, min(Bt, B))
    nb = pl.cdiv(B, Bt)
    B_pad = nb * Bt

    Tp = pl.cdiv(T_out + 1, LANE) * LANE          # lane-padded time-block width

    # hop-phase view of the signal: xph[b, j, t] = x[b, 0, t*hop + j]
    # (pure layout; the overlapping L-tap frames are rebuilt in-kernel)
    T_used = (T_out + 1) * hop                    # always <= T when L is even
    xph = x[:, 0, :T_used].reshape(B, T_out + 1, hop).transpose(0, 2, 1)
    xph = jnp.pad(xph, ((0, B_pad - B), (0, 0), (0, Tp - (T_out + 1))))

    w_enc = params["w_enc"][:, 0, :]              # [N, L]
    w_dect = params["w_dec"][:, 0, :].T           # [L, N]
    gamma = params["gamma"].reshape(N, 1)
    beta = params["beta"].reshape(N, 1)

    # VMEM budget: cache pass-0 activations when they comfortably fit (budget
    # chosen to also fit v7x's 64 MiB VMEM); otherwise fall back to
    # recomputing the cheap encoder conv in pass 1.
    cache_bytes = B_pad * N * Tp * 4
    cache_pass0 = cache_bytes <= (24 << 20)
    cache_shape = (B_pad, N, Tp) if cache_pass0 else (1, N, Tp)

    io_block_bytes = Bt * hop * Tp * 4            # one input / one output block
    est_vmem = (4 * io_block_bytes                # double-buffered in + out
                + (cache_bytes if cache_pass0 else N * Tp * 4)
                + (2 << 20))                      # weights / live vregs / slack
    vmem_limit = int(min(max(2 * est_vmem, 32 << 20), 64 << 20))

    if cache_pass0:
        # pass 1 reads from the VMEM cache: park the input on its last block so
        # no second HBM sweep of the input is ever issued.
        x_index_map = lambda p, b: (b * (1 - p) + (nb - 1) * p, 0, 0)
    else:
        x_index_map = lambda p, b: (b, 0, 0)

    kernel = functools.partial(
        _fused_kernel, hop=hop, t_out=T_out, tp=Tp,
        inv_count=1.0 / float(B * T_out), block_b=Bt, cache_pass0=cache_pass0)

    o = pl.pallas_call(
        kernel,
        out_shape=jax.ShapeDtypeStruct((B_pad, hop, Tp), jnp.float32),
        grid_spec=pltpu.PrefetchScalarGridSpec(
            num_scalar_prefetch=0,
            grid=(2, nb),                          # (pass, batch-block)
            in_specs=[
                pl.BlockSpec((Bt, hop, Tp), x_index_map),
                pl.BlockSpec((N, L), lambda p, b: (0, 0)),
                pl.BlockSpec((L, N), lambda p, b: (0, 0)),
                pl.BlockSpec((N, 1), lambda p, b: (0, 0)),
                pl.BlockSpec((N, 1), lambda p, b: (0, 0)),
            ],
            # pass 0 parks the output on block 0 (zero-initialized in-kernel);
            # pass 1 fully rewrites block b, which is what lands in HBM.
            out_specs=pl.BlockSpec((Bt, hop, Tp), lambda p, b: (b * p, 0, 0)),
            scratch_shapes=[
                pltpu.VMEM((N, 1), jnp.float32),   # running sum
                pltpu.VMEM((N, 1), jnp.float32),   # running sum of squares
                pltpu.VMEM((N, 1), jnp.float32),   # folded BN scale (x2)
                pltpu.VMEM((N, 1), jnp.float32),   # folded BN shift (x2)
                pltpu.VMEM(cache_shape, jnp.float32),  # pass-0 activation cache
            ],
        ),
        compiler_params=pltpu.CompilerParams(
            # both axes carry the cross-batch BN-statistics dependency.
            # TODO(synk): on v7x, shard the batch-block axis across the two
            # TensorCores with a tiny cross-core reduction of sum/sumsq.
            dimension_semantics=("arbitrary", "arbitrary"),
            vmem_limit_bytes=vmem_limit),
    )(xph, w_enc, w_dect, gamma, beta)

    # TODO(synk): the hop-sublane -> time-lane interleave could be fused
    # in-kernel (XLU shuffle) to emit [B, 1, T] directly and drop this op.
    return o[:B, :, :T_out + 1].transpose(0, 2, 1).reshape(
        B, 1, (T_out + 1) * hop)


# ---------------- pure-JAX reference (numerical self-check only) ------------ #

def _padding(y, K):
    B, N, Lc = y.shape
    P = K // 2
    gap = K - (P + Lc % K) % K
    if gap > 0:
        y = jnp.concatenate([y, jnp.zeros((B, N, gap), y.dtype)], axis=2)
    pad = jnp.zeros((B, N, P), y.dtype)
    return jnp.concatenate([pad, y, pad], axis=2), gap


def _segmentation(y, K):
    B, N, _ = y.shape
    P = K // 2
    y, gap = _padding(y, K)
    y1 = y[:, :, :-P].reshape(B, N, -1, K)
    y2 = y[:, :, P:].reshape(B, N, -1, K)
    y = jnp.concatenate([y1, y2], axis=3).reshape(B, N, -1, K).transpose(0, 1, 3, 2)
    return y, gap


def _over_add(chunks, gap):
    B, N, K, _ = chunks.shape
    P = K // 2
    z = chunks.transpose(0, 1, 3, 2).reshape(B, N, -1, K * 2)
    z1 = z[:, :, :, :K].reshape(B, N, -1)[:, :, P:]
    z2 = z[:, :, :, K:].reshape(B, N, -1)[:, :, :-P]
    z = z1 + z2
    if gap > 0:
        z = z[:, :, :-gap]
    return z


def _reference_forward(x, params, L, K):
    B, _, T = x.shape
    hop = L // 2
    T_out = (T - L) // hop + 1
    idx = jnp.arange(T_out)[:, None] * hop + jnp.arange(L)[None, :]
    frames = x[:, 0, :][:, idx]                                        # [B, T_out, L]
    y = jnp.einsum("btl,nl->bnt", frames, params["w_enc"][:, 0, :])
    mean = jnp.mean(y, axis=(0, 2), keepdims=True)
    var = jnp.mean((y - mean) ** 2, axis=(0, 2), keepdims=True)        # biased (train BN)
    y = (y - mean) * jax.lax.rsqrt(var + EPS)
    y = jnp.maximum(y * params["gamma"][None, :, None]
                    + params["beta"][None, :, None], 0.0)
    chunks, gap = _segmentation(y, K)
    z = _over_add(chunks, gap)                                         # == 2*y
    f = jnp.einsum("bnt,nl->btl", z, params["w_dec"][:, 0, :])         # [B, T_out, L]
    zero = jnp.zeros((B, 1, hop), f.dtype)
    first = jnp.concatenate([f[:, :, :hop], zero], axis=1)
    second = jnp.concatenate([zero, f[:, :, hop:]], axis=1)
    return (first + second).reshape(B, 1, (T_out + 1) * hop)


# ----------------------------------- main ----------------------------------- #

if __name__ == "__main__":
    # module hyper-params: N filters, kernel L (stride L//2), chunk size K, signal T
    N, L, K, num_blocks, T = 8, 4, 8, 2, 64
    B = 2

    key = jax.random.PRNGKey(0)
    k1, k2, k3, k4, k5 = jax.random.split(key, 5)
    params = {
        "w_enc": 0.5 * jax.random.normal(k1, (N, 1, L), jnp.float32),   # Conv1d weight
        "w_dec": 0.5 * jax.random.normal(k2, (N, 1, L), jnp.float32),   # ConvTranspose1d weight
        "gamma": 1.0 + 0.1 * jax.random.normal(k3, (N,), jnp.float32),  # BN weight
        "beta": 0.1 * jax.random.normal(k4, (N,), jnp.float32),         # BN bias
    }
    x = jax.random.normal(k5, (B, 1, T), jnp.float32)

    fwd = jax.jit(functools.partial(encoder_decoder_forward, L=L, K=K))
    out = fwd(x, params)
    jax.block_until_ready(out)

    hop = L // 2
    T_out = (T - L) // hop + 1
    assert out.shape == (B, 1, (T_out + 1) * hop), out.shape

    ref = _reference_forward(x, params, L, K)
    err = float(jnp.max(jnp.abs(out - ref)))
    assert err < 1e-3, f"mismatch vs pure-JAX reference: max abs err {err}"
    print("KERNEL_OK")
</pallas_src>

<mosaic_0001>
module attributes {stable_mosaic.version = 11 : i64} {
  func.func @_fused_kernel(%arg0: i32, %arg1: i32, %arg2: memref<2x2x128xf32, #tpu.memory_space<vmem>>, %arg3: memref<8x4xf32, #tpu.memory_space<vmem>>, %arg4: memref<4x8xf32, #tpu.memory_space<vmem>>, %arg5: memref<8x1xf32, #tpu.memory_space<vmem>>, %arg6: memref<8x1xf32, #tpu.memory_space<vmem>>, %arg7: memref<2x2x128xf32, #tpu.memory_space<vmem>>, %arg8: memref<8x1xf32, #tpu.memory_space<vmem>>, %arg9: memref<8x1xf32, #tpu.memory_space<vmem>>, %arg10: memref<8x1xf32, #tpu.memory_space<vmem>>, %arg11: memref<8x1xf32, #tpu.memory_space<vmem>>, %arg12: memref<2x8x128xf32, #tpu.memory_space<vmem>>) attributes {dimension_semantics = [#tpu.dimension_semantics<arbitrary>, #tpu.dimension_semantics<arbitrary>], iteration_bounds = array<i64: 2, 1>, scalar_prefetch = 0 : i64, scratch_operands = 5 : i64, tpu.core_type = #tpu.core_type<tc>, window_params = [{transform_indices = @transform_0, window_bounds = array<i64: 2, 2, 128>}, {pipeline_mode = #tpu.pipeline_mode<synchronous>, transform_indices = @transform_1, window_bounds = array<i64: 8, 4>}, {pipeline_mode = #tpu.pipeline_mode<synchronous>, transform_indices = @transform_2, window_bounds = array<i64: 4, 8>}, {pipeline_mode = #tpu.pipeline_mode<synchronous>, transform_indices = @transform_3, window_bounds = array<i64: 8, 1>}, {pipeline_mode = #tpu.pipeline_mode<synchronous>, transform_indices = @transform_4, window_bounds = array<i64: 8, 1>}, {transform_indices = @transform_5, window_bounds = array<i64: 2, 2, 128>}]} {
    %0 = tpu.iota {dimensions = array<i32: 1>} : vector<1x128xi32>
    %c31_i32 = arith.constant 31 : i32
    %1 = vector.broadcast %c31_i32 : i32 to vector<1x128xi32>
    %2 = arith.cmpi slt, %0, %1 : vector<1x128xi32>
    %c0_i32 = arith.constant 0 : i32
    %3 = arith.cmpi eq, %arg0, %c0_i32 : i32
    %c0_i32_0 = arith.constant 0 : i32
    %4 = arith.cmpi eq, %arg1, %c0_i32_0 : i32
    %5 = arith.andi %3, %4 : i1
    %6 = arith.extui %5 : i1 to i32
    %c0_i32_1 = arith.constant 0 : i32
    %7 = arith.cmpi ne, %6, %c0_i32_1 : i32
    scf.if %7 {
      %cst = arith.constant 0.000000e+00 : f32
      %19 = vector.broadcast %cst : f32 to vector<8x1xf32>
      %c0 = arith.constant 0 : index
      %c0_8 = arith.constant 0 : index
      %20 = vector.load %arg8[%c0, %c0_8] : memref<8x1xf32, #tpu.memory_space<vmem>>, vector<8x1xf32>
      tpu.vector_store %arg8[%c0, %c0_8], %19 {strides = array<i32>} : memref<8x1xf32, #tpu.memory_space<vmem>>, vector<8x1xf32>,
      %cst_9 = arith.constant 0.000000e+00 : f32
      %21 = vector.broadcast %cst_9 : f32 to vector<8x1xf32>
      %c0_10 = arith.constant 0 : index
      %c0_11 = arith.constant 0 : index
      %22 = vector.load %arg9[%c0_10, %c0_11] : memref<8x1xf32, #tpu.memory_space<vmem>>, vector<8x1xf32>
      tpu.vector_store %arg9[%c0_10, %c0_11], %21 {strides = array<i32>} : memref<8x1xf32, #tpu.memory_space<vmem>>, vector<8x1xf32>,
      %cst_12 = arith.constant 0.000000e+00 : f32
      %23 = vector.broadcast %cst_12 : f32 to vector<2x2x128xf32>
      %c0_13 = arith.constant 0 : index
      %c0_14 = arith.constant 0 : index
      %c0_15 = arith.constant 0 : index
      %24 = vector.load %arg7[%c0_13, %c0_14, %c0_15] : memref<2x2x128xf32, #tpu.memory_space<vmem>>, vector<2x2x128xf32>
      tpu.vector_store %arg7[%c0_13, %c0_14, %c0_15], %23 {strides = array<i32>} : memref<2x2x128xf32, #tpu.memory_space<vmem>>, vector<2x2x128xf32>,
    } else {
    }
    %c0_i32_2 = arith.constant 0 : i32
    %8 = arith.cmpi eq, %arg0, %c0_i32_2 : i32
    %9 = arith.extui %8 : i1 to i32
    %c0_i32_3 = arith.constant 0 : i32
    %10 = arith.cmpi ne, %9, %c0_i32_3 : i32
    scf.if %10 {
      %c0 = arith.constant 0 : index
      %c0_8 = arith.constant 0 : index
      %c0_9 = arith.constant 0 : index
      %19 = vector.load %arg2[%c0, %c0_8, %c0_9] : memref<2x2x128xf32, #tpu.memory_space<vmem>>, vector<1x2x128xf32>
      %20 = vector.shape_cast %19 : vector<1x2x128xf32> to vector<2x128xf32>
      %c127_i32 = arith.constant 127 : i32
      %21 = tpu.dynamic_rotate %20 by %c127_i32 dim 1 : vector<2x128xf32>, i32 -> vector<2x128xf32>
      %c0_10 = arith.constant 0 : index
      %c0_11 = arith.constant 0 : index
      %22 = vector.load %arg3[%c0_10, %c0_11] : memref<8x4xf32, #tpu.memory_space<vmem>>, vector<8x4xf32>
      %23 = vector.extract_strided_slice %22 {offsets = [0, 0], sizes = [8, 1], strides = [1, 1]} : vector<8x4xf32> to vector<8x1xf32>
      %24 = vector.extract_strided_slice %20 {offsets = [0, 0], sizes = [1, 128], strides = [1, 1]} : vector<2x128xf32> to vector<1x128xf32>
      %25 = vector.broadcast %23 : vector<8x1xf32> to vector<8x128xf32>
      %26 = vector.broadcast %24 : vector<1x128xf32> to vector<8x128xf32>
      %27 = arith.mulf %25, %26 : vector<8x128xf32>
      %28 = vector.extract_strided_slice %22 {offsets = [0, 1], sizes = [8, 1], strides = [1, 1]} : vector<8x4xf32> to vector<8x1xf32>
      %29 = vector.extract_strided_slice %20 {offsets = [1, 0], sizes = [1, 128], strides = [1, 1]} : vector<2x128xf32> to vector<1x128xf32>
      %30 = vector.broadcast %28 : vector<8x1xf32> to vector<8x128xf32>
      %31 = vector.broadcast %29 : vector<1x128xf32> to vector<8x128xf32>
      %32 = arith.mulf %30, %31 : vector<8x128xf32>
      %33 = arith.addf %27, %32 : vector<8x128xf32>
      %34 = vector.extract_strided_slice %22 {offsets = [0, 2], sizes = [8, 1], strides = [1, 1]} : vector<8x4xf32> to vector<8x1xf32>
      %35 = vector.extract_strided_slice %21 {offsets = [0, 0], sizes = [1, 128], strides = [1, 1]} : vector<2x128xf32> to vector<1x128xf32>
      %36 = vector.broadcast %34 : vector<8x1xf32> to vector<8x128xf32>
      %37 = vector.broadcast %35 : vector<1x128xf32> to vector<8x128xf32>
      %38 = arith.mulf %36, %37 : vector<8x128xf32>
      %39 = arith.addf %33, %38 : vector<8x128xf32>
      %40 = vector.extract_strided_slice %22 {offsets = [0, 3], sizes = [8, 1], strides = [1, 1]} : vector<8x4xf32> to vector<8x1xf32>
      %41 = vector.extract_strided_slice %21 {offsets = [1, 0], sizes = [1, 128], strides = [1, 1]} : vector<2x128xf32> to vector<1x128xf32>
      %42 = vector.broadcast %40 : vector<8x1xf32> to vector<8x128xf32>
      %43 = vector.broadcast %41 : vector<1x128xf32> to vector<8x128xf32>
      %44 = arith.mulf %42, %43 : vector<8x128xf32>
      %45 = arith.addf %39, %44 : vector<8x128xf32>
      %cst = arith.constant 0.000000e+00 : f32
      %46 = vector.shape_cast %2 : vector<1x128xi1> to vector<1x128xi1>
      %47 = vector.broadcast %46 : vector<1x128xi1> to vector<8x128xi1>
      %48 = vector.broadcast %cst : f32 to vector<8x128xf32>
      %49 = arith.select %47, %45, %48 : vector<8x128xi1>, vector<8x128xf32>
      %c2_i32 = arith.constant 2 : i32
      %50 = arith.muli %arg1, %c2_i32 : i32
      %c0_i32_12 = arith.constant 0 : i32
      %51 = arith.addi %50, %c0_i32_12 : i32
      %52 = arith.index_cast %51 : i32 to index
      %c0_13 = arith.constant 0 : index
      %c0_14 = arith.constant 0 : index
      %53 = vector.load %arg12[%52, %c0_13, %c0_14] : memref<2x8x128xf32, #tpu.memory_space<vmem>>, vector<1x8x128xf32>
      %54 = vector.shape_cast %53 : vector<1x8x128xf32> to vector<8x128xf32>
      %55 = vector.shape_cast %49 : vector<8x128xf32> to vector<1x8x128xf32>
      tpu.vector_store %arg12[%52, %c0_13, %c0_14], %55 {strides = array<i32>} : memref<2x8x128xf32, #tpu.memory_space<vmem>>, vector<1x8x128xf32>,
      %cst_15 = arith.constant dense<0.000000e+00> : vector<8xf32>
      %56 = vector.multi_reduction <add>, %49, %cst_15 [1] : vector<8x128xf32> to vector<8xf32>
      %57 = vector.shape_cast %56 : vector<8xf32> to vector<8x1xf32>
      %58 = arith.mulf %49, %49 : vector<8x128xf32>
      %cst_16 = arith.constant dense<0.000000e+00> : vector<8xf32>
      %59 = vector.multi_reduction <add>, %58, %cst_16 [1] : vector<8x128xf32> to vector<8xf32>
      %60 = vector.shape_cast %59 : vector<8xf32> to vector<8x1xf32>
      %c1 = arith.constant 1 : index
      %c0_17 = arith.constant 0 : index
      %c0_18 = arith.constant 0 : index
      %61 = vector.load %arg2[%c1, %c0_17, %c0_18] : memref<2x2x128xf32, #tpu.memory_space<vmem>>, vector<1x2x128xf32>
      %62 = vector.shape_cast %61 : vector<1x2x128xf32> to vector<2x128xf32>
      %c127_i32_19 = arith.constant 127 : i32
      %63 = tpu.dynamic_rotate %62 by %c127_i32_19 dim 1 : vector<2x128xf32>, i32 -> vector<2x128xf32>
      %c0_20 = arith.constant 0 : index
      %c0_21 = arith.constant 0 : index
      %64 = vector.load %arg3[%c0_20, %c0_21] : memref<8x4xf32, #tpu.memory_space<vmem>>, vector<8x4xf32>
      %65 = vector.extract_strided_slice %64 {offsets = [0, 0], sizes = [8, 1], strides = [1, 1]} : vector<8x4xf32> to vector<8x1xf32>
      %66 = vector.extract_strided_slice %62 {offsets = [0, 0], sizes = [1, 128], strides = [1, 1]} : vector<2x128xf32> to vector<1x128xf32>
      %67 = vector.broadcast %65 : vector<8x1xf32> to vector<8x128xf32>
      %68 = vector.broadcast %66 : vector<1x128xf32> to vector<8x128xf32>
      %69 = arith.mulf %67, %68 : vector<8x128xf32>
      %70 = vector.extract_strided_slice %64 {offsets = [0, 1], sizes = [8, 1], strides = [1, 1]} : vector<8x4xf32> to vector<8x1xf32>
      %71 = vector.extract_strided_slice %62 {offsets = [1, 0], sizes = [1, 128], strides = [1, 1]} : vector<2x128xf32> to vector<1x128xf32>
      %72 = vector.broadcast %70 : vector<8x1xf32> to vector<8x128xf32>
      %73 = vector.broadcast %71 : vector<1x128xf32> to vector<8x128xf32>
      %74 = arith.mulf %72, %73 : vector<8x128xf32>
      %75 = arith.addf %69, %74 : vector<8x128xf32>
      %76 = vector.extract_strided_slice %64 {offsets = [0, 2], sizes = [8, 1], strides = [1, 1]} : vector<8x4xf32> to vector<8x1xf32>
      %77 = vector.extract_strided_slice %63 {offsets = [0, 0], sizes = [1, 128], strides = [1, 1]} : vector<2x128xf32> to vector<1x128xf32>
      %78 = vector.broadcast %76 : vector<8x1xf32> to vector<8x128xf32>
      %79 = vector.broadcast %77 : vector<1x128xf32> to vector<8x128xf32>
      %80 = arith.mulf %78, %79 : vector<8x128xf32>
      %81 = arith.addf %75, %80 : vector<8x128xf32>
      %82 = vector.extract_strided_slice %64 {offsets = [0, 3], sizes = [8, 1], strides = [1, 1]} : vector<8x4xf32> to vector<8x1xf32>
      %83 = vector.extract_strided_slice %63 {offsets = [1, 0], sizes = [1, 128], strides = [1, 1]} : vector<2x128xf32> to vector<1x128xf32>
      %84 = vector.broadcast %82 : vector<8x1xf32> to vector<8x128xf32>
      %85 = vector.broadcast %83 : vector<1x128xf32> to vector<8x128xf32>
      %86 = arith.mulf %84, %85 : vector<8x128xf32>
      %87 = arith.addf %81, %86 : vector<8x128xf32>
      %cst_22 = arith.constant 0.000000e+00 : f32
      %88 = vector.shape_cast %2 : vector<1x128xi1> to vector<1x128xi1>
      %89 = vector.broadcast %88 : vector<1x128xi1> to vector<8x128xi1>
      %90 = vector.broadcast %cst_22 : f32 to vector<8x128xf32>
      %91 = arith.select %89, %87, %90 : vector<8x128xi1>, vector<8x128xf32>
      %c2_i32_23 = arith.constant 2 : i32
      %92 = arith.muli %arg1, %c2_i32_23 : i32
      %c1_i32_24 = arith.constant 1 : i32
      %93 = arith.addi %92, %c1_i32_24 : i32
      %94 = arith.index_cast %93 : i32 to index
      %c0_25 = arith.constant 0 : index
      %c0_26 = arith.constant 0 : index
      %95 = vector.load %arg12[%94, %c0_25, %c0_26] : memref<2x8x128xf32, #tpu.memory_space<vmem>>, vector<1x8x128xf32>
      %96 = vector.shape_cast %95 : vector<1x8x128xf32> to vector<8x128xf32>
      %97 = vector.shape_cast %91 : vector<8x128xf32> to vector<1x8x128xf32>
      tpu.vector_store %arg12[%94, %c0_25, %c0_26], %97 {strides = array<i32>} : memref<2x8x128xf32, #tpu.memory_space<vmem>>, vector<1x8x128xf32>,
      %cst_27 = arith.constant dense<0.000000e+00> : vector<8xf32>
      %98 = vector.multi_reduction <add>, %91, %cst_27 [1] : vector<8x128xf32> to vector<8xf32>
      %99 = vector.shape_cast %98 : vector<8xf32> to vector<8x1xf32>
      %100 = arith.mulf %91, %91 : vector<8x128xf32>
      %cst_28 = arith.constant dense<0.000000e+00> : vector<8xf32>
      %101 = vector.multi_reduction <add>, %100, %cst_28 [1] : vector<8x128xf32> to vector<8xf32>
      %102 = vector.shape_cast %101 : vector<8xf32> to vector<8x1xf32>
      %103 = arith.addf %57, %99 : vector<8x1xf32>
      %104 = arith.addf %60, %102 : vector<8x1xf32>
      %c0_29 = arith.constant 0 : index
      %c0_30 = arith.constant 0 : index
      %105 = vector.load %arg8[%c0_29, %c0_30] : memref<8x1xf32, #tpu.memory_space<vmem>>, vector<8x1xf32>
      %106 = arith.addf %105, %103 : vector<8x1xf32>
      %c0_31 = arith.constant 0 : index
      %c0_32 = arith.constant 0 : index
      %107 = vector.load %arg8[%c0_31, %c0_32] : memref<8x1xf32, #tpu.memory_space<vmem>>, vector<8x1xf32>
      tpu.vector_store %arg8[%c0_31, %c0_32], %106 {strides = array<i32>} : memref<8x1xf32, #tpu.memory_space<vmem>>, vector<8x1xf32>,
      %c0_33 = arith.constant 0 : index
      %c0_34 = arith.constant 0 : index
      %108 = vector.load %arg9[%c0_33, %c0_34] : memref<8x1xf32, #tpu.memory_space<vmem>>, vector<8x1xf32>
      %109 = arith.addf %108, %104 : vector<8x1xf32>
      %c0_35 = arith.constant 0 : index
      %c0_36 = arith.constant 0 : index
      %110 = vector.load %arg9[%c0_35, %c0_36] : memref<8x1xf32, #tpu.memory_space<vmem>>, vector<8x1xf32>
      tpu.vector_store %arg9[%c0_35, %c0_36], %109 {strides = array<i32>} : memref<8x1xf32, #tpu.memory_space<vmem>>, vector<8x1xf32>,
    } else {
    }
    %c1_i32 = arith.constant 1 : i32
    %11 = arith.cmpi eq, %arg0, %c1_i32 : i32
    %c0_i32_4 = arith.constant 0 : i32
    %12 = arith.cmpi eq, %arg1, %c0_i32_4 : i32
    %13 = arith.andi %11, %12 : i1
    %14 = arith.extui %13 : i1 to i32
    %c0_i32_5 = arith.constant 0 : i32
    %15 = arith.cmpi ne, %14, %c0_i32_5 : i32
    scf.if %15 {
      %c0 = arith.constant 0 : index
      %c0_8 = arith.constant 0 : index
      %19 = vector.load %arg8[%c0, %c0_8] : memref<8x1xf32, #tpu.memory_space<vmem>>, vector<8x1xf32>
      %cst = arith.constant 0.0161290318 : f32
      %20 = vector.broadcast %cst : f32 to vector<8x1xf32>
      %21 = arith.mulf %19, %20 : vector<8x1xf32>
      %c0_9 = arith.constant 0 : index
      %c0_10 = arith.constant 0 : index
      %22 = vector.load %arg9[%c0_9, %c0_10] : memref<8x1xf32, #tpu.memory_space<vmem>>, vector<8x1xf32>
      %cst_11 = arith.constant 0.0161290318 : f32
      %23 = vector.broadcast %cst_11 : f32 to vector<8x1xf32>
      %24 = arith.mulf %22, %23 : vector<8x1xf32>
      %25 = arith.mulf %21, %21 : vector<8x1xf32>
      %26 = arith.subf %24, %25 : vector<8x1xf32>
      %c0_12 = arith.constant 0 : index
      %c0_13 = arith.constant 0 : index
      %27 = vector.load %arg5[%c0_12, %c0_13] : memref<8x1xf32, #tpu.memory_space<vmem>>, vector<8x1xf32>
      %cst_14 = arith.constant 9.99999974E-6 : f32
      %28 = vector.broadcast %cst_14 : f32 to vector<8x1xf32>
      %29 = arith.addf %26, %28 : vector<8x1xf32>
      %30 = math.rsqrt %29 : vector<8x1xf32>
      %31 = arith.mulf %27, %30 : vector<8x1xf32>
      %cst_15 = arith.constant 2.000000e+00 : f32
      %32 = vector.broadcast %cst_15 : f32 to vector<8x1xf32>
      %33 = arith.mulf %32, %31 : vector<8x1xf32>
      %c0_16 = arith.constant 0 : index
      %c0_17 = arith.constant 0 : index
      %34 = vector.load %arg10[%c0_16, %c0_17] : memref<8x1xf32, #tpu.memory_space<vmem>>, vector<8x1xf32>
      tpu.vector_store %arg10[%c0_16, %c0_17], %33 {strides = array<i32>} : memref<8x1xf32, #tpu.memory_space<vmem>>, vector<8x1xf32>,
      %c0_18 = arith.constant 0 : index
      %c0_19 = arith.constant 0 : index
      %35 = vector.load %arg6[%c0_18, %c0_19] : memref<8x1xf32, #tpu.memory_space<vmem>>, vector<8x1xf32>
      %36 = arith.mulf %21, %31 : vector<8x1xf32>
      %37 = arith.subf %35, %36 : vector<8x1xf32>
      %cst_20 = arith.constant 2.000000e+00 : f32
      %38 = vector.broadcast %cst_20 : f32 to vector<8x1xf32>
      %39 = arith.mulf %38, %37 : vector<8x1xf32>
      %c0_21 = arith.constant 0 : index
      %c0_22 = arith.constant 0 : index
      %40 = vector.load %arg11[%c0_21, %c0_22] : memref<8x1xf32, #tpu.memory_space<vmem>>, vector<8x1xf32>
      tpu.vector_store %arg11[%c0_21, %c0_22], %39 {strides = array<i32>} : memref<8x1xf32, #tpu.memory_space<vmem>>, vector<8x1xf32>,
    } else {
    }
    %c1_i32_6 = arith.constant 1 : i32
    %16 = arith.cmpi eq, %arg0, %c1_i32_6 : i32
    %17 = arith.extui %16 : i1 to i32
    %c0_i32_7 = arith.constant 0 : i32
    %18 = arith.cmpi ne, %17, %c0_i32_7 : i32
    scf.if %18 {
      %c0 = arith.constant 0 : index
      %c0_8 = arith.constant 0 : index
      %19 = vector.load %arg10[%c0, %c0_8] : memref<8x1xf32, #tpu.memory_space<vmem>>, vector<8x1xf32>
      %c0_9 = arith.constant 0 : index
      %c0_10 = arith.constant 0 : index
      %20 = vector.load %arg11[%c0_9, %c0_10] : memref<8x1xf32, #tpu.memory_space<vmem>>, vector<8x1xf32>
      %c2_i32 = arith.constant 2 : i32
      %21 = arith.muli %arg1, %c2_i32 : i32
      %c0_i32_11 = arith.constant 0 : i32
      %22 = arith.addi %21, %c0_i32_11 : i32
      %23 = arith.index_cast %22 : i32 to index
      %c0_12 = arith.constant 0 : index
      %c0_13 = arith.constant 0 : index
      %24 = vector.load %arg12[%23, %c0_12, %c0_13] : memref<2x8x128xf32, #tpu.memory_space<vmem>>, vector<1x8x128xf32>
      %25 = vector.shape_cast %24 : vector<1x8x128xf32> to vector<8x128xf32>
      %26 = vector.broadcast %19 : vector<8x1xf32> to vector<8x128xf32>
      %27 = arith.mulf %25, %26 : vector<8x128xf32>
      %28 = vector.broadcast %20 : vector<8x1xf32> to vector<8x128xf32>
      %29 = arith.addf %27, %28 : vector<8x128xf32>
      %cst = arith.constant 0.000000e+00 : f32
      %30 = vector.broadcast %cst : f32 to vector<8x128xf32>
      %31 = arith.maximumf %29, %30 : vector<8x128xf32>
      %cst_14 = arith.constant 0.000000e+00 : f32
      %32 = vector.shape_cast %2 : vector<1x128xi1> to vector<1x128xi1>
      %33 = vector.broadcast %32 : vector<1x128xi1> to vector<8x128xi1>
      %34 = vector.broadcast %cst_14 : f32 to vector<8x128xf32>
      %35 = arith.select %33, %31, %34 : vector<8x128xi1>, vector<8x128xf32>
      %c0_15 = arith.constant 0 : index
      %c0_16 = arith.constant 0 : index
      %36 = vector.load %arg4[%c0_15, %c0_16] : memref<4x8xf32, #tpu.memory_space<vmem>>, vector<4x8xf32>
      %37 = vector.extract_strided_slice %36 {offsets = [0, 0], sizes = [4, 1], strides = [1, 1]} : vector<4x8xf32> to vector<4x1xf32>
      %38 = vector.extract_strided_slice %35 {offsets = [0, 0], sizes = [1, 128], strides = [1, 1]} : vector<8x128xf32> to vector<1x128xf32>
      %39 = vector.broadcast %37 : vector<4x1xf32> to vector<4x128xf32>
      %40 = vector.broadcast %38 : vector<1x128xf32> to vector<4x128xf32>
      %41 = arith.mulf %39, %40 : vector<4x128xf32>
      %42 = vector.extract_strided_slice %36 {offsets = [0, 1], sizes = [4, 1], strides = [1, 1]} : vector<4x8xf32> to vector<4x1xf32>
      %43 = vector.extract_strided_slice %35 {offsets = [1, 0], sizes = [1, 128], strides = [1, 1]} : vector<8x128xf32> to vector<1x128xf32>
      %44 = vector.broadcast %42 : vector<4x1xf32> to vector<4x128xf32>
      %45 = vector.broadcast %43 : vector<1x128xf32> to vector<4x128xf32>
      %46 = arith.mulf %44, %45 : vector<4x128xf32>
      %47 = arith.addf %41, %46 : vector<4x128xf32>
      %48 = vector.extract_strided_slice %36 {offsets = [0, 2], sizes = [4, 1], strides = [1, 1]} : vector<4x8xf32> to vector<4x1xf32>
      %49 = vector.extract_strided_slice %35 {offsets = [2, 0], sizes = [1, 128], strides = [1, 1]} : vector<8x128xf32> to vector<1x128xf32>
      %50 = vector.broadcast %48 : vector<4x1xf32> to vector<4x128xf32>
      %51 = vector.broadcast %49 : vector<1x128xf32> to vector<4x128xf32>
      %52 = arith.mulf %50, %51 : vector<4x128xf32>
      %53 = arith.addf %47, %52 : vector<4x128xf32>
      %54 = vector.extract_strided_slice %36 {offsets = [0, 3], sizes = [4, 1], strides = [1, 1]} : vector<4x8xf32> to vector<4x1xf32>
      %55 = vector.extract_strided_slice %35 {offsets = [3, 0], sizes = [1, 128], strides = [1, 1]} : vector<8x128xf32> to vector<1x128xf32>
      %56 = vector.broadcast %54 : vector<4x1xf32> to vector<4x128xf32>
      %57 = vector.broadcast %55 : vector<1x128xf32> to vector<4x128xf32>
      %58 = arith.mulf %56, %57 : vector<4x128xf32>
      %59 = arith.addf %53, %58 : vector<4x128xf32>
      %60 = vector.extract_strided_slice %36 {offsets = [0, 4], sizes = [4, 1], strides = [1, 1]} : vector<4x8xf32> to vector<4x1xf32>
      %61 = vector.extract_strided_slice %35 {offsets = [4, 0], sizes = [1, 128], strides = [1, 1]} : vector<8x128xf32> to vector<1x128xf32>
      %62 = vector.broadcast %60 : vector<4x1xf32> to vector<4x128xf32>
      %63 = vector.broadcast %61 : vector<1x128xf32> to vector<4x128xf32>
      %64 = arith.mulf %62, %63 : vector<4x128xf32>
      %65 = arith.addf %59, %64 : vector<4x128xf32>
      %66 = vector.extract_strided_slice %36 {offsets = [0, 5], sizes = [4, 1], strides = [1, 1]} : vector<4x8xf32> to vector<4x1xf32>
      %67 = vector.extract_strided_slice %35 {offsets = [5, 0], sizes = [1, 128], strides = [1, 1]} : vector<8x128xf32> to vector<1x128xf32>
      %68 = vector.broadcast %66 : vector<4x1xf32> to vector<4x128xf32>
      %69 = vector.broadcast %67 : vector<1x128xf32> to vector<4x128xf32>
      %70 = arith.mulf %68, %69 : vector<4x128xf32>
      %71 = arith.addf %65, %70 : vector<4x128xf32>
      %72 = vector.extract_strided_slice %36 {offsets = [0, 6], sizes = [4, 1], strides = [1, 1]} : vector<4x8xf32> to vector<4x1xf32>
      %73 = vector.extract_strided_slice %35 {offsets = [6, 0], sizes = [1, 128], strides = [1, 1]} : vector<8x128xf32> to vector<1x128xf32>
      %74 = vector.broadcast %72 : vector<4x1xf32> to vector<4x128xf32>
      %75 = vector.broadcast %73 : vector<1x128xf32> to vector<4x128xf32>
      %76 = arith.mulf %74, %75 : vector<4x128xf32>
      %77 = arith.addf %71, %76 : vector<4x128xf32>
      %78 = vector.extract_strided_slice %36 {offsets = [0, 7], sizes = [4, 1], strides = [1, 1]} : vector<4x8xf32> to vector<4x1xf32>
      %79 = vector.extract_strided_slice %35 {offsets = [7, 0], sizes = [1, 128], strides = [1, 1]} : vector<8x128xf32> to vector<1x128xf32>
      %80 = vector.broadcast %78 : vector<4x1xf32> to vector<4x128xf32>
      %81 = vector.broadcast %79 : vector<1x128xf32> to vector<4x128xf32>
      %82 = arith.mulf %80, %81 : vector<4x128xf32>
      %83 = arith.addf %77, %82 : vector<4x128xf32>
      %84 = vector.extract_strided_slice %83 {offsets = [0, 0], sizes = [2, 128], strides = [1, 1]} : vector<4x128xf32> to vector<2x128xf32>
      %85 = vector.extract_strided_slice %83 {offsets = [2, 0], sizes = [2, 128], strides = [1, 1]} : vector<4x128xf32> to vector<2x128xf32>
      %c1_i32_17 = arith.constant 1 : i32
      %86 = tpu.dynamic_rotate %85 by %c1_i32_17 dim 1 : vector<2x128xf32>, i32 -> vector<2x128xf32>
      %87 = arith.addf %84, %86 : vector<2x128xf32>
      %c0_18 = arith.constant 0 : index
      %c0_19 = arith.constant 0 : index
      %c0_20 = arith.constant 0 : index
      %88 = vector.load %arg7[%c0_18, %c0_19, %c0_20] : memref<2x2x128xf32, #tpu.memory_space<vmem>>, vector<1x2x128xf32>
      %89 = vector.shape_cast %88 : vector<1x2x128xf32> to vector<2x128xf32>
      %90 = vector.shape_cast %87 : vector<2x128xf32> to vector<1x2x128xf32>
      tpu.vector_store %arg7[%c0_18, %c0_19, %c0_20], %90 {strides = array<i32>} : memref<2x2x128xf32, #tpu.memory_space<vmem>>, vector<1x2x128xf32>,
      %c2_i32_21 = arith.constant 2 : i32
      %91 = arith.muli %arg1, %c2_i32_21 : i32
      %c1_i32_22 = arith.constant 1 : i32
      %92 = arith.addi %91, %c1_i32_22 : i32
      %93 = arith.index_cast %92 : i32 to index
      %c0_23 = arith.constant 0 : index
      %c0_24 = arith.constant 0 : index
      %94 = vector.load %arg12[%93, %c0_23, %c0_24] : memref<2x8x128xf32, #tpu.memory_space<vmem>>, vector<1x8x128xf32>
      %95 = vector.shape_cast %94 : vector<1x8x128xf32> to vector<8x128xf32>
      %96 = vector.broadcast %19 : vector<8x1xf32> to vector<8x128xf32>
      %97 = arith.mulf %95, %96 : vector<8x128xf32>
      %98 = vector.broadcast %20 : vector<8x1xf32> to vector<8x128xf32>
      %99 = arith.addf %97, %98 : vector<8x128xf32>
      %cst_25 = arith.constant 0.000000e+00 : f32
      %100 = vector.broadcast %cst_25 : f32 to vector<8x128xf32>
      %101 = arith.maximumf %99, %100 : vector<8x128xf32>
      %cst_26 = arith.constant 0.000000e+00 : f32
      %102 = vector.shape_cast %2 : vector<1x128xi1> to vector<1x128xi1>
      %103 = vector.broadcast %102 : vector<1x128xi1> to vector<8x128xi1>
      %104 = vector.broadcast %cst_26 : f32 to vector<8x128xf32>
      %105 = arith.select %103, %101, %104 : vector<8x128xi1>, vector<8x128xf32>
      %c0_27 = arith.constant 0 : index
      %c0_28 = arith.constant 0 : index
      %106 = vector.load %arg4[%c0_27, %c0_28] : memref<4x8xf32, #tpu.memory_space<vmem>>, vector<4x8xf32>
      %107 = vector.extract_strided_slice %106 {offsets = [0, 0], sizes = [4, 1], strides = [1, 1]} : vector<4x8xf32> to vector<4x1xf32>
      %108 = vector.extract_strided_slice %105 {offsets = [0, 0], sizes = [1, 128], strides = [1, 1]} : vector<8x128xf32> to vector<1x128xf32>
      %109 = vector.broadcast %107 : vector<4x1xf32> to vector<4x128xf32>
      %110 = vector.broadcast %108 : vector<1x128xf32> to vector<4x128xf32>
      %111 = arith.mulf %109, %110 : vector<4x128xf32>
      %112 = vector.extract_strided_slice %106 {offsets = [0, 1], sizes = [4, 1], strides = [1, 1]} : vector<4x8xf32> to vector<4x1xf32>
      %113 = vector.extract_strided_slice %105 {offsets = [1, 0], sizes = [1, 128], strides = [1, 1]} : vector<8x128xf32> to vector<1x128xf32>
      %114 = vector.broadcast %112 : vector<4x1xf32> to vector<4x128xf32>
      %115 = vector.broadcast %113 : vector<1x128xf32> to vector<4x128xf32>
      %116 = arith.mulf %114, %115 : vector<4x128xf32>
      %117 = arith.addf %111, %116 : vector<4x128xf32>
      %118 = vector.extract_strided_slice %106 {offsets = [0, 2], sizes = [4, 1], strides = [1, 1]} : vector<4x8xf32> to vector<4x1xf32>
      %119 = vector.extract_strided_slice %105 {offsets = [2, 0], sizes = [1, 128], strides = [1, 1]} : vector<8x128xf32> to vector<1x128xf32>
      %120 = vector.broadcast %118 : vector<4x1xf32> to vector<4x128xf32>
      %121 = vector.broadcast %119 : vector<1x128xf32> to vector<4x128xf32>
      %122 = arith.mulf %120, %121 : vector<4x128xf32>
      %123 = arith.addf %117, %122 : vector<4x128xf32>
      %124 = vector.extract_strided_slice %106 {offsets = [0, 3], sizes = [4, 1], strides = [1, 1]} : vector<4x8xf32> to vector<4x1xf32>
      %125 = vector.extract_strided_slice %105 {offsets = [3, 0], sizes = [1, 128], strides = [1, 1]} : vector<8x128xf32> to vector<1x128xf32>
      %126 = vector.broadcast %124 : vector<4x1xf32> to vector<4x128xf32>
      %127 = vector.broadcast %125 : vector<1x128xf32> to vector<4x128xf32>
      %128 = arith.mulf %126, %127 : vector<4x128xf32>
      %129 = arith.addf %123, %128 : vector<4x128xf32>
      %130 = vector.extract_strided_slice %106 {offsets = [0, 4], sizes = [4, 1], strides = [1, 1]} : vector<4x8xf32> to vector<4x1xf32>
      %131 = vector.extract_strided_slice %105 {offsets = [4, 0], sizes = [1, 128], strides = [1, 1]} : vector<8x128xf32> to vector<1x128xf32>
      %132 = vector.broadcast %130 : vector<4x1xf32> to vector<4x128xf32>
      %133 = vector.broadcast %131 : vector<1x128xf32> to vector<4x128xf32>
      %134 = arith.mulf %132, %133 : vector<4x128xf32>
      %135 = arith.addf %129, %134 : vector<4x128xf32>
      %136 = vector.extract_strided_slice %106 {offsets = [0, 5], sizes = [4, 1], strides = [1, 1]} : vector<4x8xf32> to vector<4x1xf32>
      %137 = vector.extract_strided_slice %105 {offsets = [5, 0], sizes = [1, 128], strides = [1, 1]} : vector<8x128xf32> to vector<1x128xf32>
      %138 = vector.broadcast %136 : vector<4x1xf32> to vector<4x128xf32>
      %139 = vector.broadcast %137 : vector<1x128xf32> to vector<4x128xf32>
      %140 = arith.mulf %138, %139 : vector<4x128xf32>
      %141 = arith.addf %135, %140 : vector<4x128xf32>
      %142 = vector.extract_strided_slice %106 {offsets = [0, 6], sizes = [4, 1], strides = [1, 1]} : vector<4x8xf32> to vector<4x1xf32>
      %143 = vector.extract_strided_slice %105 {offsets = [6, 0], sizes = [1, 128], strides = [1, 1]} : vector<8x128xf32> to vector<1x128xf32>
      %144 = vector.broadcast %142 : vector<4x1xf32> to vector<4x128xf32>
      %145 = vector.broadcast %143 : vector<1x128xf32> to vector<4x128xf32>
      %146 = arith.mulf %144, %145 : vector<4x128xf32>
      %147 = arith.addf %141, %146 : vector<4x128xf32>
      %148 = vector.extract_strided_slice %106 {offsets = [0, 7], sizes = [4, 1], strides = [1, 1]} : vector<4x8xf32> to vector<4x1xf32>
      %149 = vector.extract_strided_slice %105 {offsets = [7, 0], sizes = [1, 128], strides = [1, 1]} : vector<8x128xf32> to vector<1x128xf32>
      %150 = vector.broadcast %148 : vector<4x1xf32> to vector<4x128xf32>
      %151 = vector.broadcast %149 : vector<1x128xf32> to vector<4x128xf32>
      %152 = arith.mulf %150, %151 : vector<4x128xf32>
      %153 = arith.addf %147, %152 : vector<4x128xf32>
      %154 = vector.extract_strided_slice %153 {offsets = [0, 0], sizes = [2, 128], strides = [1, 1]} : vector<4x128xf32> to vector<2x128xf32>
      %155 = vector.extract_strided_slice %153 {offsets = [2, 0], sizes = [2, 128], strides = [1, 1]} : vector<4x128xf32> to vector<2x128xf32>
      %c1_i32_29 = arith.constant 1 : i32
      %156 = tpu.dynamic_rotate %155 by %c1_i32_29 dim 1 : vector<2x128xf32>, i32 -> vector<2x128xf32>
      %157 = arith.addf %154, %156 : vector<2x128xf32>
      %c1 = arith.constant 1 : index
      %c0_30 = arith.constant 0 : index
      %c0_31 = arith.constant 0 : index
      %158 = vector.load %arg7[%c1, %c0_30, %c0_31] : memref<2x2x128xf32, #tpu.memory_space<vmem>>, vector<1x2x128xf32>
      %159 = vector.shape_cast %158 : vector<1x2x128xf32> to vector<2x128xf32>
      %160 = vector.shape_cast %157 : vector<2x128xf32> to vector<1x2x128xf32>
      tpu.vector_store %arg7[%c1, %c0_30, %c0_31], %160 {strides = array<i32>} : memref<2x2x128xf32, #tpu.memory_space<vmem>>, vector<1x2x128xf32>,
    } else {
    }
    return
  }
  func.func @transform_0(%arg0: i32, %arg1: i32) -> (i32, i32, i32) {
    %c1_i32 = arith.constant 1 : i32
    %0 = arith.subi %c1_i32, %arg0 : i32
    %1 = arith.muli %arg1, %0 : i32
    %c0_i32 = arith.constant 0 : i32
    %2 = arith.muli %c0_i32, %arg0 : i32
    %3 = arith.addi %1, %2 : i32
    %c0_i32_0 = arith.constant 0 : i32
    %c0_i32_1 = arith.constant 0 : i32
    %c0_i32_2 = arith.constant 0 : i32
    return %3, %c0_i32_0, %c0_i32_1 : i32, i32, i32
  }
  func.func @transform_1(%arg0: i32, %arg1: i32) -> (i32, i32) {
    %c0_i32 = arith.constant 0 : i32
    %c0_i32_0 = arith.constant 0 : i32
    %c0_i32_1 = arith.constant 0 : i32
    return %c0_i32, %c0_i32_0 : i32, i32
  }
  func.func @transform_2(%arg0: i32, %arg1: i32) -> (i32, i32) {
    %c0_i32 = arith.constant 0 : i32
    %c0_i32_0 = arith.constant 0 : i32
    %c0_i32_1 = arith.constant 0 : i32
    return %c0_i32, %c0_i32_0 : i32, i32
  }
  func.func @transform_3(%arg0: i32, %arg1: i32) -> (i32, i32) {
    %c0_i32 = arith.constant 0 : i32
    %c0_i32_0 = arith.constant 0 : i32
    %c0_i32_1 = arith.constant 0 : i32
    return %c0_i32, %c0_i32_0 : i32, i32
  }
  func.func @transform_4(%arg0: i32, %arg1: i32) -> (i32, i32) {
    %c0_i32 = arith.constant 0 : i32
    %c0_i32_0 = arith.constant 0 : i32
    %c0_i32_1 = arith.constant 0 : i32
    return %c0_i32, %c0_i32_0 : i32, i32
  }
  func.func @transform_5(%arg0: i32, %arg1: i32) -> (i32, i32, i32) {
    %0 = arith.muli %arg1, %arg0 : i32
    %c0_i32 = arith.constant 0 : i32
    %c0_i32_0 = arith.constant 0 : i32
    %c0_i32_1 = arith.constant 0 : i32
    return %0, %c0_i32, %c0_i32_0 : i32, i32, i32
  }
}

</mosaic_0001>

<bundles_post_ra>
// kernel: squeeze.3
= control target key start
LH: loop header
LB: loop body
LE: loop exit
PB: predicated region body
PF: predicated region fallthrough
CT: control target
= control target key end

     0   :  { %s355_s8 = smov 122   ;;  %s356_s9 = smov 124   ;;  %vm8_vm0 = vcmask 15360   ;;  %s654_s0 = inlined_call_operand.vmem [shape: f32[2,64], index: 0, kind: input, shape index: {}]   ;;  %s655_s1 = inlined_call_operand.vmem [shape: f32[2,32,2], index: 1, kind: output, shape index: {}]  }
   0x1   :  { %v5_v0 = vld [vmem:[%s654_s0] sm:$0x3]  ;;  %s354_s0 = smov 126   ;;  %s357_s10 = smov 120  }
   0x2   :  { %6 = vst [vmem:[#allocation0] sm:$0x3] %v5_v0  ;;  %s358_s11 = smov 118   ;;  %s359_s12 = smov 116  }
   0x3   :  { %s360_s13 = smov 114   ;;  %s361_s14 = smov 112  }
   0x4   :  { %s362_s15 = smov 110   ;;  %s363_s16 = smov 108  }
   0x5   :  { %s364_s17 = smov 106   ;;  %s365_s18 = smov 104  }
   0x6   :  { %s366_s19 = smov 102   ;;  %s367_s20 = smov 100  }
   0x7   :  { %s368_s21 = smov 98   ;;  %s369_s22 = smov 96  }
   0x8   :  { %s370_s23 = smov 94   ;;  %s371_s24 = smov 92  }
   0x9   :  { %v12_v1 = vld [vmem:[#allocation0] sm:$0x3]   ;;  %s372_s25 = smov 90   ;;  %s373_s26 = smov 88  }
   0xa   :  { %v28_v2 = vld [vmem:[#allocation0] sm:$0x3]   ;;  %13 = vrot.lane.b32.xlu0 %v12_v1, %s354_s0  ;;  %s374_s27 = smov 86   ;;  %s375_s28 = smov 84  }
   0xb   :  { %29 = vrot.lane.b32.xlu1 %v28_v2, %s355_s8  ;;  %v20_v3 = vld [vmem:[#allocation0] sm:$0x3]   ;;  %s376_s29 = smov 82   ;;  %s377_s30 = smov 80  }
   0xc   :  { %v36_v4 = vld [vmem:[#allocation0] sm:$0x3]   ;;  %s378_s6 = smov 78   ;;  %s379_s7 = smov 76  }
   0xd   :  { %v44_v5 = vld [vmem:[#allocation0] sm:$0x3]   ;;  %s380_s0 = smov 74   ;;  %s381_s8 = smov 72  }
   0xe   :  { %21 = vrot.lane.b32.xlu0 %v20_v3, %s356_s9  ;;  %v52_v6 = vld [vmem:[#allocation0] sm:$0x3]   ;;  %s382_s9 = smov 70  }
   0xf   :  { %37 = vrot.lane.b32.xlu1 %v36_v4, %s357_s10  ;;  %v60_v7 = vld [vmem:[#allocation0] sm:$0x3]   ;;  %s383_s10 = smov 68  }
  0x10   :  { %v68_v8 = vld [vmem:[#allocation0] sm:$0x3]  }
  0x11   :  { %v76_v9 = vld [vmem:[#allocation0] sm:$0x3]  }
  0x12   :  { %45 = vrot.lane.b32.xlu0 %v44_v5, %s358_s11  ;;  %v84_v10 = vld [vmem:[#allocation0] sm:$0x3]   ;;  %s384_s11 = smov 66  }
  0x13   :  { %53 = vrot.lane.b32.xlu1 %v52_v6, %s359_s12  ;;  %v92_v11 = vld [vmem:[#allocation0] sm:$0x3]  }
  0x14   :  { %v100_v12 = vld [vmem:[#allocation0] sm:$0x3]  }
  0x15   :  { %v108_v13 = vld [vmem:[#allocation0] sm:$0x3]  }
  0x16   :  { %61 = vrot.lane.b32.xlu0 %v60_v7, %s360_s13  ;;  %v116_v14 = vld [vmem:[#allocation0] sm:$0x3]  }
  0x17   :  { %69 = vrot.lane.b32.xlu1 %v68_v8, %s361_s14  ;;  %v124_v15 = vld [vmem:[#allocation0] sm:$0x3]  }
  0x18   :  { %v132_v16 = vld [vmem:[#allocation0] sm:$0x3]  }
  0x19   :  { %v140_v17 = vld [vmem:[#allocation0] sm:$0x3]  }
  0x1a   :  { %77 = vrot.lane.b32.xlu0 %v76_v9, %s362_s15  ;;  %v148_v18 = vld [vmem:[#allocation0] sm:$0x3]  }
  0x1b   :  { %85 = vrot.lane.b32.xlu1 %v84_v10, %s363_s16  ;;  %v156_v19 = vld [vmem:[#allocation0] sm:$0x3]  }
  0x1c   :  { %v164_v20 = vld [vmem:[#allocation0] sm:$0x3]  }
  0x1d   :  { %v172_v21 = vld [vmem:[#allocation0] sm:$0x3]  }
  0x1e   :  { %93 = vrot.lane.b32.xlu0 %v92_v11, %s364_s17  ;;  %v180_v22 = vld [vmem:[#allocation0] sm:$0x3]  }
  0x1f   :  { %101 = vrot.lane.b32.xlu1 %v100_v12, %s365_s18  ;;  %v188_v23 = vld [vmem:[#allocation0] sm:$0x3]  }
  0x20   :  { %v196_v24 = vld [vmem:[#allocation0] sm:$0x3]  }
  0x21   :  { %v204_v25 = vld [vmem:[#allocation0] sm:$0x3]  }
  0x22   :  { %109 = vrot.lane.b32.xlu0 %v108_v13, %s366_s19  ;;  %v212_v26 = vld [vmem:[#allocation0] sm:$0x3]  }
  0x23   :  { %117 = vrot.lane.b32.xlu1 %v116_v14, %s367_s20  ;;  %v7_v27 = vld [vmem:[#allocation0] sm:$0x3]  }
  0x24   :  { %9 = vst.msk [vmem:[%s655_s1] sm:$0x1] %vm8_vm0, %v7_v27   ;;  %260 = vst.msk [vmem:[%s655_s1 + $0x1f] sm:$0x2] %vm8_vm0, %v7_v27   ;;  %v220_v28 = vld [vmem:[#allocation0] sm:$0x3]  }
  0x25   :  { %v228_v29 = vld [vmem:[#allocation0] sm:$0x3]  }
  0x26   :  { %125 = vrot.lane.b32.xlu0 %v124_v15, %s368_s21  ;;  %v236_v30 = vld [vmem:[#allocation0] sm:$0x3]  }
  0x27   :  { %133 = vrot.lane.b32.xlu1 %v132_v16, %s369_s22  ;;  %v244_v31 = vld [vmem:[#allocation0] sm:$0x3]  }
  0x28   :  { %v252_v32 = vld [vmem:[#allocation0] sm:$0x3]  }
  0x2a   :  { %141 = vrot.lane.b32.xlu0 %v140_v17, %s370_s23 }
  0x2b   :  { %149 = vrot.lane.b32.xlu1 %v148_v18, %s371_s24 }
  0x2e   :  { %157 = vrot.lane.b32.xlu0 %v156_v19, %s372_s25 }
  0x2f   :  { %165 = vrot.lane.b32.xlu1 %v164_v20, %s373_s26 }
  0x32   :  { %173 = vrot.lane.b32.xlu0 %v172_v21, %s374_s27 }
  0x33   :  { %181 = vrot.lane.b32.xlu1 %v180_v22, %s375_s28 }
  0x36   :  { %189 = vrot.lane.b32.xlu0 %v188_v23, %s376_s29 }
  0x37   :  { %197 = vrot.lane.b32.xlu1 %v196_v24, %s377_s30 }
  0x3a   :  { %205 = vrot.lane.b32.xlu0 %v204_v25, %s378_s6 }
  0x3b   :  { %213 = vrot.lane.b32.xlu1 %v212_v26, %s379_s7 }
  0x3e   :  { %221 = vrot.lane.b32.xlu0 %v220_v28, %s380_s0 }
  0x3f   :  { %229 = vrot.lane.b32.xlu1 %v228_v29, %s381_s8 }
  0x42   :  { %237 = vrot.lane.b32.xlu0 %v236_v30, %s382_s9 }
  0x43   :  { %245 = vrot.lane.b32.xlu1 %v244_v31, %s383_s10 }
  0x46   :  { %253 = vrot.lane.b32.xlu0 %v252_v32, %s384_s11 }
  0x7c   :  { %v14_v33 = vpop.permute.xlu0 %13  }
  0x7d   :  { %v30_v34 = vpop.permute.xlu1 %29   ;;  %261 = vst.msk [vmem:[%s655_s1 + $0x1] sm:$0x1] %vm8_vm0, %v14_v33   ;;  %262 = vst.msk [vmem:[%s655_s1 + $0x20] sm:$0x2] %vm8_vm0, %v14_v33  }
  0x7e   :  { %265 = vst.msk [vmem:[%s655_s1 + $0x3] sm:$0x1] %vm8_vm0, %v30_v34   ;;  %266 = vst.msk [vmem:[%s655_s1 + $0x22] sm:$0x2] %vm8_vm0, %v30_v34  }
  0x80   :  { %v22_v35 = vpop.permute.xlu0 %21  }
  0x81   :  { %v38_v36 = vpop.permute.xlu1 %37   ;;  %263 = vst.msk [vmem:[%s655_s1 + $0x2] sm:$0x1] %vm8_vm0, %v22_v35   ;;  %264 = vst.msk [vmem:[%s655_s1 + $0x21] sm:$0x2] %vm8_vm0, %v22_v35  }
  0x82   :  { %267 = vst.msk [vmem:[%s655_s1 + $0x4] sm:$0x1] %vm8_vm0, %v38_v36   ;;  %268 = vst.msk [vmem:[%s655_s1 + $0x23] sm:$0x2] %vm8_vm0, %v38_v36  }
  0x84   :  { %v46_v37 = vpop.permute.xlu0 %45  }
  0x85   :  { %v54_v38 = vpop.permute.xlu1 %53   ;;  %269 = vst.msk [vmem:[%s655_s1 + $0x5] sm:$0x1] %vm8_vm0, %v46_v37   ;;  %270 = vst.msk [vmem:[%s655_s1 + $0x24] sm:$0x2] %vm8_vm0, %v46_v37  }
  0x86   :  { %271 = vst.msk [vmem:[%s655_s1 + $0x6] sm:$0x1] %vm8_vm0, %v54_v38   ;;  %272 = vst.msk [vmem:[%s655_s1 + $0x25] sm:$0x2] %vm8_vm0, %v54_v38  }
  0x88   :  { %v62_v39 = vpop.permute.xlu0 %61  }
  0x89   :  { %v70_v40 = vpop.permute.xlu1 %69   ;;  %273 = vst.msk [vmem:[%s655_s1 + $0x7] sm:$0x1] %vm8_vm0, %v62_v39   ;;  %274 = vst.msk [vmem:[%s655_s1 + $0x26] sm:$0x2] %vm8_vm0, %v62_v39  }
  0x8a   :  { %275 = vst.msk [vmem:[%s655_s1 + $0x8] sm:$0x1] %vm8_vm0, %v70_v40   ;;  %276 = vst.msk [vmem:[%s655_s1 + $0x27] sm:$0x2] %vm8_vm0, %v70_v40  }
  0x8c   :  { %v78_v41 = vpop.permute.xlu0 %77  }
  0x8d   :  { %v86_v42 = vpop.permute.xlu1 %85   ;;  %277 = vst.msk [vmem:[%s655_s1 + $0x9] sm:$0x1] %vm8_vm0, %v78_v41   ;;  %278 = vst.msk [vmem:[%s655_s1 + $0x28] sm:$0x2] %vm8_vm0, %v78_v41  }
  0x8e   :  { %279 = vst.msk [vmem:[%s655_s1 + $0xa] sm:$0x1] %vm8_vm0, %v86_v42   ;;  %280 = vst.msk [vmem:[%s655_s1 + $0x29] sm:$0x2] %vm8_vm0, %v86_v42  }
  0x90   :  { %v94_v43 = vpop.permute.xlu0 %93  }
  0x91   :  { %v102_v44 = vpop.permute.xlu1 %101   ;;  %281 = vst.msk [vmem:[%s655_s1 + $0xb] sm:$0x1] %vm8_vm0, %v94_v43   ;;  %282 = vst.msk [vmem:[%s655_s1 + $0x2a] sm:$0x2] %vm8_vm0, %v94_v43  }
  0x92   :  { %283 = vst.msk [vmem:[%s655_s1 + $0xc] sm:$0x1] %vm8_vm0, %v102_v44   ;;  %284 = vst.msk [vmem:[%s655_s1 + $0x2b] sm:$0x2] %vm8_vm0, %v102_v44  }
  0x94   :  { %v110_v45 = vpop.permute.xlu0 %109  }
  0x95   :  { %v118_v46 = vpop.permute.xlu1 %117   ;;  %285 = vst.msk [vmem:[%s655_s1 + $0xd] sm:$0x1] %vm8_vm0, %v110_v45   ;;  %286 = vst.msk [vmem:[%s655_s1 + $0x2c] sm:$0x2] %vm8_vm0, %v110_v45  }
  0x96   :  { %287 = vst.msk [vmem:[%s655_s1 + $0xe] sm:$0x1] %vm8_vm0, %v118_v46   ;;  %288 = vst.msk [vmem:[%s655_s1 + $0x2d] sm:$0x2] %vm8_vm0, %v118_v46  }
  0x98   :  { %v126_v47 = vpop.permute.xlu0 %125  }
  0x99   :  { %v134_v48 = vpop.permute.xlu1 %133   ;;  %289 = vst.msk [vmem:[%s655_s1 + $0xf] sm:$0x1] %vm8_vm0, %v126_v47   ;;  %290 = vst.msk [vmem:[%s655_s1 + $0x2e] sm:$0x2] %vm8_vm0, %v126_v47  }
  0x9a   :  { %291 = vst.msk [vmem:[%s655_s1 + $0x10] sm:$0x1] %vm8_vm0, %v134_v48   ;;  %292 = vst.msk [vmem:[%s655_s1 + $0x2f] sm:$0x2] %vm8_vm0, %v134_v48  }
  0x9c   :  { %v142_v49 = vpop.permute.xlu0 %141  }
  0x9d   :  { %v150_v50 = vpop.permute.xlu1 %149   ;;  %293 = vst.msk [vmem:[%s655_s1 + $0x11] sm:$0x1] %vm8_vm0, %v142_v49   ;;  %294 = vst.msk [vmem:[%s655_s1 + $0x30] sm:$0x2] %vm8_vm0, %v142_v49  }
  0x9e   :  { %295 = vst.msk [vmem:[%s655_s1 + $0x12] sm:$0x1] %vm8_vm0, %v150_v50   ;;  %296 = vst.msk [vmem:[%s655_s1 + $0x31] sm:$0x2] %vm8_vm0, %v150_v50  }
  0xa0   :  { %v158_v51 = vpop.permute.xlu0 %157  }
  0xa1   :  { %v166_v52 = vpop.permute.xlu1 %165   ;;  %297 = vst.msk [vmem:[%s655_s1 + $0x13] sm:$0x1] %vm8_vm0, %v158_v51   ;;  %298 = vst.msk [vmem:[%s655_s1 + $0x32] sm:$0x2] %vm8_vm0, %v158_v51  }
  0xa2   :  { %299 = vst.msk [vmem:[%s655_s1 + $0x14] sm:$0x1] %vm8_vm0, %v166_v52   ;;  %300 = vst.msk [vmem:[%s655_s1 + $0x33] sm:$0x2] %vm8_vm0, %v166_v52  }
  0xa4   :  { %v174_v53 = vpop.permute.xlu0 %173  }
  0xa5   :  { %v182_v54 = vpop.permute.xlu1 %181   ;;  %301 = vst.msk [vmem:[%s655_s1 + $0x15] sm:$0x1] %vm8_vm0, %v174_v53   ;;  %302 = vst.msk [vmem:[%s655_s1 + $0x34] sm:$0x2] %vm8_vm0, %v174_v53  }
  0xa6   :  { %303 = vst.msk [vmem:[%s655_s1 + $0x16] sm:$0x1] %vm8_vm0, %v182_v54   ;;  %304 = vst.msk [vmem:[%s655_s1 + $0x35] sm:$0x2] %vm8_vm0, %v182_v54  }
  0xa8   :  { %v190_v55 = vpop.permute.xlu0 %189  }
  0xa9   :  { %v198_v56 = vpop.permute.xlu1 %197   ;;  %305 = vst.msk [vmem:[%s655_s1 + $0x17] sm:$0x1] %vm8_vm0, %v190_v55   ;;  %306 = vst.msk [vmem:[%s655_s1 + $0x36] sm:$0x2] %vm8_vm0, %v190_v55  }
  0xaa   :  { %307 = vst.msk [vmem:[%s655_s1 + $0x18] sm:$0x1] %vm8_vm0, %v198_v56   ;;  %308 = vst.msk [vmem:[%s655_s1 + $0x37] sm:$0x2] %vm8_vm0, %v198_v56  }
  0xac   :  { %v206_v57 = vpop.permute.xlu0 %205  }
  0xad   :  { %v214_v58 = vpop.permute.xlu1 %213   ;;  %309 = vst.msk [vmem:[%s655_s1 + $0x19] sm:$0x1] %vm8_vm0, %v206_v57   ;;  %310 = vst.msk [vmem:[%s655_s1 + $0x38] sm:$0x2] %vm8_vm0, %v206_v57  }
  0xae   :  { %311 = vst.msk [vmem:[%s655_s1 + $0x1a] sm:$0x1] %vm8_vm0, %v214_v58   ;;  %312 = vst.msk [vmem:[%s655_s1 + $0x39] sm:$0x2] %vm8_vm0, %v214_v58  }
  0xb0   :  { %v222_v59 = vpop.permute.xlu0 %221  }
  0xb1   :  { %v230_v60 = vpop.permute.xlu1 %229   ;;  %313 = vst.msk [vmem:[%s655_s1 + $0x1b] sm:$0x1] %vm8_vm0, %v222_v59   ;;  %314 = vst.msk [vmem:[%s655_s1 + $0x3a] sm:$0x2] %vm8_vm0, %v222_v59  }
  0xb2   :  { %315 = vst.msk [vmem:[%s655_s1 + $0x1c] sm:$0x1] %vm8_vm0, %v230_v60   ;;  %316 = vst.msk [vmem:[%s655_s1 + $0x3b] sm:$0x2] %vm8_vm0, %v230_v60  }
  0xb4   :  { %v238_v61 = vpop.permute.xlu0 %237  }
  0xb5   :  { %v246_v62 = vpop.permute.xlu1 %245   ;;  %317 = vst.msk [vmem:[%s655_s1 + $0x1d] sm:$0x1] %vm8_vm0, %v238_v61   ;;  %318 = vst.msk [vmem:[%s655_s1 + $0x3c] sm:$0x2] %vm8_vm0, %v238_v61  }
  0xb6   :  { %319 = vst.msk [vmem:[%s655_s1 + $0x1e] sm:$0x1] %vm8_vm0, %v246_v62   ;;  %320 = vst.msk [vmem:[%s655_s1 + $0x3d] sm:$0x2] %vm8_vm0, %v246_v62  }
  0xb8   :  { %v254_v63 = vpop.permute.xlu0 %253  }
  0xb9   :  { %321 = vst.msk [vmem:[%s655_s1 + $0x1f] sm:$0x1] %vm8_vm0, %v254_v63   ;;  %322 = vst.msk [vmem:[%s655_s1 + $0x3e] sm:$0x2] %vm8_vm0, %v254_v63  }

// kernel: encoder_decoder_forward.1
= control target key start
LH: loop header
LB: loop body
LE: loop exit
PB: predicated region body
PF: predicated region fallthrough
CT: control target
= control target key end

     0   :  { %s861_s18 = smov 0   ;;  %s863_s19 = smov 0   ;;  %s951_s0 = inlined_call_operand.vmem [shape: f32[2,2,128], index: 0, kind: input, shape index: {}]   ;;  %s952_s1 = inlined_call_operand.vmem [shape: f32[8,4], index: 1, kind: input, shape index: {}]   ;;  %s953_s2 = inlined_call_operand.vmem [shape: f32[4,8], index: 2, kind: input, shape index: {}]   ;;  %s954_s3 = inlined_call_operand.vmem [shape: f32[8,1], index: 3, kind: input, shape index: {}]   ;;  %s955_s4 = inlined_call_operand.vmem [shape: f32[8,1], index: 4, kind: input, shape index: {}]   ;;  %s956_s5 = inlined_call_operand.vmem [shape: f32[2,2,128], index: 5, kind: output, shape index: {}]  }
   0x1   :  { %s865_s20 = smov 0  }
   0x2 LB: > { %s27_s21 = sadd.s32 1, %s810_s19  ;;  %p714_p0 = scmp.ge.s32.totalorder %s814_s20, 1  ;;  %s814_s20 = sphi %s865_s20, %s15_s20   ;;  %s810_s19 = sphi %s863_s19, %s958_s19   ;;  %s806_s18 = sphi %s861_s18, %s957_s18  }
   0x3   : > { %p29_p1 = scmp.ge.s32.totalorder %s27_s21, 2  ;;  %p210_p2 = scmp.lt.s32.totalorder %s814_s20, 3 }
   0x5   : > { %s960_s21 = smov (%p29_p1, %s27_s21), 0  ;;  %p211_p3 = pnand %p714_p0, %p210_p2 }
   0x6   : > { %p262_p4 = scmp.eq.s32.totalorder (!%p211_p3), %s806_s18, 0 }
   0x7   : > { %214 = sbr.rel (%p211_p3) target bundleno = 669 (0x29d), region = 40 }
   0xc   : > { %v259_v0 = vlaneseq  ;;  %267 = sbr.rel (!%p262_p4) target bundleno = 17 (0x11), region = 44  ;;  %vm268_vm1 = vcmask (%p262_p4), 7168   ;;  %v816_v2 = vmov (%p262_p4), 0.0  }
   0xd   : > { %269 = vst.msk [vmem:[#allocation2] sm:$0xff] (%p262_p4), %vm268_vm1, %v816_v2  ;;  %270 = vst.msk [vmem:[#allocation3] sm:$0xff] (%p262_p4), %vm268_vm1, %v816_v2 }
   0xe   : > { %v883_v1 = vand.u32 127, %v259_v0  ;;  %271 = vst [vmem:[%s956_s5] sm:$0x3] (%p262_p4), %v816_v2  ;;  %272 = vst [vmem:[%s956_s5 + $0x2] sm:$0x3] (%p262_p4), %v816_v2 }
  0x10   : > { %vm261_vm0 = vcmp.lt.s32.totalorder %v883_v1, 31 }
  0x11 PF: > { %p716_p5 = scmp.ne.s32.totalorder %s806_s18, 0 }
  0x12   : > { %s821_s30 = smov (!%p716_p5), 127  }
  0x13   : > { %275 = sbr.rel (%p716_p5) target bundleno = 329 (0x149), region = 48 }
  0x18   : > { %v336_v3 = vld [vmem:[%s952_s1] sm:$0xff]  ;;  %v817_v4 = vmov 0   ;;  %v818_v5 = vmov 1   ;;  %v819_v6 = vmov 2   ;;  %v820_v8 = vmov 3   ;;  %v393_v55 = vld [vmem:[#allocation3] sm:$0xff] }
  0x19   : > { %770 = vset.pattern.permute.xlu1 %v817_v4  ;;  %768 = vset.pattern.permute.xlu0 %v817_v4  ;;  %v276_v7 = vld [vmem:[%s951_s0] sm:$0x3]  ;;  %v717_v9 = vld [vmem:[%s951_s0 + $0x2] sm:$0x3]  ;;  %v286_v12 = vshrl.u32 %v259_v0, 7  ;;  %vm391_vm2 = vcmask 7168  }
  0x1a   : > { %339 = vperm.xlu1 %770, %v336_v3   ;;  %282 = vperm.xlu0 %768, %v336_v3   ;;  %v389_v50 = vld [vmem:[#allocation2] sm:$0xff] }
  0x1b   : > { %v296_v13 = vsub.s32 1, %v286_v12  ;;  %v287_v16 = vsub.s32 0, %v286_v12 }
  0x1d   : > { %v288_v17 = vrot.slane %v276_v7, %v287_v16  ;;  %v297_v18 = vrot.slane %v276_v7, %v296_v13  ;;  %v354_v29 = vrot.slane %v717_v9, %v296_v13  ;;  %v345_v33 = vrot.slane %v717_v9, %v287_v16 }
  0x1e   : > { %771 = vset.pattern.permute.xlu1 %v818_v5  ;;  %769 = vset.pattern.permute.xlu0 %v818_v5 }
  0x1f   : > { %348 = vperm.xlu1 %771, %v336_v3   ;;  %291 = vperm.xlu0 %769, %v336_v3  }
  0x23   : > { %772 = vset.pattern.permute.xlu1 %v819_v6  ;;  %773 = vset.pattern.permute.xlu0 %v819_v6 }
  0x24   : > { %301 = vperm.xlu1 %772, %v336_v3   ;;  %358 = vperm.xlu0 %773, %v336_v3  }
  0x28   : > { %774 = vset.pattern.permute.xlu1 %v820_v8  ;;  %277 = vrot.lane.b32.xlu0 %v276_v7, %s821_s30 }
  0x29   : > { %311 = vperm.xlu1 %774, %v336_v3   ;;  %775 = vset.pattern.permute.xlu0 %v820_v8 }
  0x2d   : > { %368 = vperm.xlu1 %774, %v336_v3  }
  0x31   : > { %334 = vrot.lane.b32.xlu1 %v717_v9, %s821_s30 }
  0x95   : > { %v340_v10 = vpop.permute.xlu1 %339  ;;  %v283_v11 = vpop.permute.xlu0 %282 }
  0x96   : > { %v289_v21 = vmul.f32 %v288_v17, %v283_v11  ;;  %v346_v38 = vmul.f32 %v345_v33, %v340_v10 }
  0x9a   : > { %v349_v14 = vpop.permute.xlu1 %348  ;;  %v292_v15 = vpop.permute.xlu0 %291 }
  0x9b   : > { %v298_v22 = vmul.f32 %v297_v18, %v292_v15  ;;  %v355_v35 = vmul.f32 %v354_v29, %v349_v14 }
  0x9d   : > { %v299_v27 = vadd.f32 %v298_v22, %v289_v21  ;;  %v356_v42 = vadd.f32 %v355_v35, %v346_v38 }
  0x9f   : > { %v302_v19 = vpop.permute.xlu1 %301  ;;  %v359_v20 = vpop.permute.xlu0 %358 }
  0xa3   : > { %v278_v23 = vpop.permute.xlu0 %277 }
  0xa4   : > { %v307_v24 = vrot.slane %v278_v23, %v287_v16  ;;  %v317_v25 = vrot.slane %v278_v23, %v296_v13  ;;  %v312_v26 = vpop.permute.xlu1 %311 }
  0xa6   : > { %v308_v28 = vmul.f32 %v307_v24, %v302_v19  ;;  %v318_v30 = vmul.f32 %v317_v25, %v312_v26 }
  0xa8   : > { %v369_v31 = vpop.permute.xlu1 %368  ;;  %v309_v32 = vadd.f32 %v308_v28, %v299_v27 }
  0xaa   : > { %v319_v34 = vadd.f32 %v318_v30, %v309_v32 }
  0xac   : > { %v335_v36 = vpop.permute.xlu1 %334  ;;  %v322_v37 = vsel %vm261_vm0, %v319_v34, 0.0 }
  0xad   : > { %v364_v39 = vrot.slane %v335_v36, %v287_v16  ;;  %v374_v40 = vrot.slane %v335_v36, %v296_v13  ;;  %327 = vadd.xlane.f32.xlu0 %v322_v37  ;;  %326 = vst [vmem:[#allocation6] sm:$0xff] %v322_v37  ;;  %v329_v41 = vmul.f32 %v322_v37, %v322_v37 }
  0xaf   : > { %v365_v43 = vmul.f32 %v364_v39, %v359_v20  ;;  %330 = vadd.xlane.f32.xlu1 %v329_v41  ;;  %v375_v44 = vmul.f32 %v374_v40, %v369_v31 }
  0xb1   : > { %v366_v45 = vadd.f32 %v365_v43, %v356_v42 }
  0xb3   : > { %v376_v46 = vadd.f32 %v375_v44, %v366_v45 }
  0xb5   : > { %v377_v47 = vsel %vm261_vm0, %v376_v46, 0.0 }
  0xb6   : > { %718 = vst [vmem:[#allocation6 + $0x8] sm:$0xff] %v377_v47  ;;  %382 = vadd.xlane.f32.xlu0 %v377_v47  ;;  %v384_v48 = vmul.f32 %v377_v47, %v377_v47 }
  0xba   : > { %385 = vadd.xlane.f32.xlu0 %v384_v48 }
 0x136   : > { %v328_v49 = vpop.xlane.xlu0 %327 }
 0x138   : > { %v331_v54 = vpop.xlane.xlu1 %330 }
 0x13f   : > { %v383_v51 = vpop.xlane.xlu0 %382 }
 0x140   : > { %v387_v52 = vadd.f32 %v383_v51, %v328_v49 }
 0x142   : > { %v390_v53 = vadd.f32 %v389_v50, %v387_v52 }
 0x143   : > { %v386_v56 = vpop.xlane.xlu0 %385 }
 0x144   : > { %392 = vst.msk [vmem:[#allocation2] sm:$0xff] %vm391_vm2, %v390_v53  ;;  %v388_v57 = vadd.f32 %v386_v56, %v331_v54 }
 0x146   : > { %v394_v58 = vadd.f32 %v393_v55, %v388_v57 }
 0x148   : > { %395 = vst.msk [vmem:[#allocation3] sm:$0xff] %vm391_vm2, %v394_v58 }
 0x149 PF: > { %p396_p6 = scmp.eq.s32.totalorder %s806_s18, 1 }
 0x14a   : > { %v407_v4 = vld [vmem:[%s954_s3] sm:$0xff] (%p396_p6)  ;;  %vm412_vm3 = vcmask (%p396_p6), 7168  }
 0x14b   : > { %400 = sbr.rel (!%p396_p6) target bundleno = 365 (0x16d), region = 52  ;;  %v401_v59 = vld [vmem:[#allocation2] sm:$0xff] (%p396_p6) }
 0x14c   : > { %v402_v61 = vmul.f32 (%p396_p6), 0.016129032, %v401_v59  ;;  %v414_v7 = vld [vmem:[%s955_s4] sm:$0xff] (%p396_p6) }
 0x14e   : > { %v405_v63 = vmul.f32 (%p396_p6), %v402_v61, %v402_v61 }
 0x14f   : > { %v403_v60 = vld [vmem:[#allocation3] sm:$0xff] (%p396_p6) }
 0x150   : > { %v404_v62 = vmul.f32 0.016129032, %v403_v60 }
 0x152   : > { %v406_v2 = vsub.f32 %v404_v62, %v405_v63 }
 0x154   : > { %v408_v3 = vadd.f32 1e-05, %v406_v2 }
 0x156   : > { %776 = vrsqrt.f32 %v408_v3 }
 0x163   : > { %v777_v5 = vpop.eup %776 }
 0x164   : > { %v410_v6 = vmul.f32 %v777_v5, %v407_v4 }
 0x166   : > { %v411_v8 = vmul.f32 2.0, %v410_v6  ;;  %v415_v9 = vmul.f32 %v410_v6, %v402_v61 }
 0x168   : > { %413 = vst.msk [vmem:[#allocation4] sm:$0xff] %vm412_vm3, %v411_v8  ;;  %v416_v10 = vsub.f32 %v414_v7, %v415_v9 }
 0x16a   : > { %v417_v11 = vmul.f32 2.0, %v416_v10 }
 0x16c   : > { %418 = vst.msk [vmem:[#allocation5] sm:$0xff] %vm412_vm3, %v417_v11 }
 0x16d PF: > { %p720_p7 = scmp.ne.s32.totalorder %s806_s18, 1 }
 0x16e   : > { %s830_s16 = smov (!%p720_p7), 1  }
 0x16f   : > { %421 = sbr.rel (%p720_p7) target bundleno = 669 (0x29d), region = 56 }
 0x174   : > { %v444_v12 = vld [vmem:[%s953_s2] sm:$0xf]  ;;  %v422_v13 = vld [vmem:[#allocation4] sm:$0xff]  ;;  %v822_v14 = vmov 0   ;;  %v423_v15 = vld [vmem:[#allocation5] sm:$0xff]  ;;  %v823_v16 = vmov 1  }
 0x175   : > { %779 = vset.pattern.permute.xlu1 %v822_v14  ;;  %778 = vset.pattern.permute.xlu0 %v822_v14  ;;  %v540_v17 = vld [vmem:[%s953_s2] sm:$0xf]  ;;  %v824_v18 = vmov 2   ;;  %v825_v19 = vmov 3   ;;  %v826_v20 = vmov 5   ;;  %v827_v21 = vmov 4  }
 0x176   : > { %447 = vperm.xlu1 %779, %v444_v12   ;;  %430 = vperm.xlu0 %778, %v422_v13   ;;  %v828_v22 = vmov 6   ;;  %v829_v23 = vmov 7   ;;  %v427_v26 = vld [vmem:[#allocation6] sm:$0xff]  ;;  %v721_v28 = vld [vmem:[#allocation6 + $0x8] sm:$0xff]  ;;  %v922_v35 = vshrl.u32 %v259_v0, 7 }
 0x178   : > { %v452_v39 = vsub.s32 0, %v922_v35  ;;  %v461_v40 = vsub.s32 1, %v922_v35  ;;  %v471_v0 = vsub.s32 2, %v922_v35  ;;  %v481_v47 = vsub.s32 3, %v922_v35 }
 0x179   : > { %v491_v50 = vsub.s32 4, %v922_v35  ;;  %v501_v3 = vsub.s32 5, %v922_v35  ;;  %v511_v5 = vsub.s32 6, %v922_v35 }
 0x17a   : > { %780 = vset.pattern.permute.xlu1 %v823_v16  ;;  %436 = vperm.xlu0 %778, %v423_v15  }
 0x17b   : > { %456 = vperm.xlu1 %780, %v444_v12  }
 0x17e   : > { %543 = vperm.xlu0 %778, %v540_v17  }
 0x17f   : > { %552 = vperm.xlu1 %780, %v540_v17  }
 0x182   : > { %781 = vset.pattern.permute.xlu0 %v824_v18 }
 0x183   : > { %782 = vset.pattern.permute.xlu1 %v824_v18  ;;  %466 = vperm.xlu0 %781, %v444_v12  }
 0x184   : > { %562 = vperm.xlu1 %782, %v540_v17  }
 0x187   : > { %784 = vset.pattern.permute.xlu0 %v825_v19 }
 0x188   : > { %783 = vset.pattern.permute.xlu1 %v825_v19  ;;  %572 = vperm.xlu0 %784, %v540_v17  }
 0x189   : > { %476 = vperm.xlu1 %783, %v444_v12  }
 0x18c   : > { %786 = vset.pattern.permute.xlu0 %v826_v20 }
 0x18d   : > { %785 = vset.pattern.permute.xlu1 %v827_v21  ;;  %496 = vperm.xlu0 %786, %v444_v12  }
 0x18e   : > { %486 = vperm.xlu1 %785, %v444_v12  }
 0x191   : > { %789 = vset.pattern.permute.xlu0 %v828_v22 }
 0x192   : > { %582 = vperm.xlu1 %785, %v540_v17   ;;  %602 = vperm.xlu0 %789, %v540_v17  }
 0x196   : > { %787 = vset.pattern.permute.xlu1 %v826_v20  ;;  %791 = vset.pattern.permute.xlu0 %v829_v23 }
 0x197   : > { %592 = vperm.xlu1 %787, %v540_v17  }
 0x19b   : > { %788 = vset.pattern.permute.xlu1 %v828_v22 }
 0x19c   : > { %506 = vperm.xlu1 %788, %v444_v12  }
 0x1a0   : > { %790 = vset.pattern.permute.xlu1 %v829_v23 }
 0x1a1   : > { %516 = vperm.xlu1 %790, %v444_v12  }
 0x1a5   : > { %612 = vperm.xlu1 %790, %v540_v17   ;;  %v521_v17 = vsub.s32 7, %v922_v35 }
 0x1f1   : > { %v448_v24 = vpop.permute.xlu1 %447  ;;  %v431_v25 = vpop.permute.xlu0 %430 }
 0x1f2   : > { %v433_v29 = vmul.f32 %v431_v25, %v427_v26  ;;  %v536_v32 = vmul.f32 %v721_v28, %v431_v25 }
 0x1f5   : > { %v437_v30 = vpop.permute.xlu0 %436 }
 0x1f6   : > { %v457_v27 = vpop.permute.xlu1 %456  ;;  %v439_v33 = vadd.f32 %v437_v30, %v433_v29  ;;  %v537_v34 = vadd.f32 %v536_v32, %v437_v30 }
 0x1f8   : > { %v440_v37 = vmax.f32 %v439_v33, 0.0  ;;  %v538_v38 = vmax.f32 %v537_v34, 0.0 }
 0x1f9   : > { %v544_v43 = vpop.permute.xlu0 %543 }
 0x1fa   : > { %v553_v31 = vpop.permute.xlu1 %552  ;;  %v443_v41 = vsel %vm261_vm0, %v440_v37, 0.0  ;;  %v539_v44 = vsel %vm261_vm0, %v538_v38, 0.0 }
 0x1fb   : > { %v453_v45 = vrot.slane %v443_v41, %v452_v39  ;;  %v462_v46 = vrot.slane %v443_v41, %v461_v40  ;;  %v558_v49 = vrot.slane %v539_v44, %v461_v40  ;;  %v549_v53 = vrot.slane %v539_v44, %v452_v39 }
 0x1fc   : > { %v472_v54 = vrot.slane %v443_v41, %v471_v0  ;;  %v482_v56 = vrot.slane %v443_v41, %v481_v47  ;;  %v568_v1 = vrot.slane %v539_v44, %v471_v0  ;;  %v492_v62 = vrot.slane %v443_v41, %v491_v50 }
 0x1fd   : > { %v454_v51 = vmul.f32 %v453_v45, %v448_v24  ;;  %v463_v52 = vmul.f32 %v462_v46, %v457_v27  ;;  %v559_v58 = vmul.f32 %v558_v49, %v553_v31  ;;  %v550_v60 = vmul.f32 %v549_v53, %v544_v43 }
 0x1fe   : > { %v467_v55 = vpop.permute.xlu0 %466  ;;  %v578_v63 = vrot.slane %v539_v44, %v481_v47  ;;  %v502_v13 = vrot.slane %v443_v41, %v501_v3  ;;  %v588_v14 = vrot.slane %v539_v44, %v491_v50  ;;  %v598_v16 = vrot.slane %v539_v44, %v501_v3 }
 0x1ff   : > { %v563_v36 = vpop.permute.xlu1 %562  ;;  %v464_v59 = vadd.f32 %v463_v52, %v454_v51  ;;  %v473_v61 = vmul.f32 %v472_v54, %v467_v55  ;;  %v560_v7 = vadd.f32 %v559_v58, %v550_v60  ;;  %v512_v22 = vrot.slane %v443_v41, %v511_v5 }
 0x200   : > { %v569_v9 = vmul.f32 %v568_v1, %v563_v36  ;;  %v522_v29 = vrot.slane %v443_v41, %v521_v17  ;;  %v608_v32 = vrot.slane %v539_v44, %v511_v5  ;;  %v618_v38 = vrot.slane %v539_v44, %v521_v17 }
 0x201   : > { %v474_v8 = vadd.f32 %v473_v61, %v464_v59 }
 0x202   : > { %v570_v18 = vadd.f32 %v569_v9, %v560_v7 }
 0x203   : > { %v573_v4 = vpop.permute.xlu0 %572 }
 0x204   : > { %v477_v42 = vpop.permute.xlu1 %476  ;;  %v579_v11 = vmul.f32 %v578_v63, %v573_v4 }
 0x205   : > { %v483_v2 = vmul.f32 %v482_v56, %v477_v42 }
 0x206   : > { %v580_v23 = vadd.f32 %v579_v11, %v570_v18 }
 0x207   : > { %v484_v12 = vadd.f32 %v483_v2, %v474_v8 }
 0x208   : > { %v497_v15 = vpop.permute.xlu0 %496 }
 0x209   : > { %v487_v48 = vpop.permute.xlu1 %486  ;;  %v503_v24 = vmul.f32 %v502_v13, %v497_v15 }
 0x20a   : > { %v493_v10 = vmul.f32 %v492_v62, %v487_v48 }
 0x20c   : > { %v494_v19 = vadd.f32 %v493_v10, %v484_v12 }
 0x20d   : > { %v583_v57 = vpop.permute.xlu1 %582  ;;  %v603_v30 = vpop.permute.xlu0 %602 }
 0x20e   : > { %v589_v20 = vmul.f32 %v588_v14, %v583_v57  ;;  %v504_v27 = vadd.f32 %v503_v24, %v494_v19  ;;  %v609_v37 = vmul.f32 %v608_v32, %v603_v30 }
 0x210   : > { %v590_v28 = vadd.f32 %v589_v20, %v580_v23 }
 0x212   : > { %v593_v6 = vpop.permute.xlu1 %592 }
 0x213   : > { %v599_v25 = vmul.f32 %v598_v16, %v593_v6 }
 0x215   : > { %v600_v33 = vadd.f32 %v599_v25, %v590_v28 }
 0x217   : > { %v507_v21 = vpop.permute.xlu1 %506  ;;  %v610_v40 = vadd.f32 %v609_v37, %v600_v33 }
 0x218   : > { %v513_v26 = vmul.f32 %v512_v22, %v507_v21 }
 0x21a   : > { %v514_v34 = vadd.f32 %v513_v26, %v504_v27 }
 0x21c   : > { %v517_v31 = vpop.permute.xlu1 %516 }
 0x21d   : > { %v523_v36 = vmul.f32 %v522_v29, %v517_v31 }
 0x21f   : > { %v524_v35 = vadd.f32 %v523_v36, %v514_v34 }
 0x220   : > { %v613_v39 = vpop.permute.xlu1 %612 }
 0x221   : > { %v619_v42 = vmul.f32 %v618_v38, %v613_v39  ;;  %v526_v43 = vrot.slane %v524_v35, 2 }
 0x223   : > { %v620_v45 = vadd.f32 %v619_v42, %v610_v40  ;;  %528 = vrot.lane.b32.xlu0 %v526_v43, %s830_s16 }
 0x225   : > { %v622_v46 = vrot.slane %v620_v45, 2 }
 0x227   : > { %624 = vrot.lane.b32.xlu1 %v622_v46, %s830_s16 }
 0x295   : > { %v529_v0 = vpop.permute.xlu0 %528 }
 0x296   : > { %v530_v41 = vadd.f32 %v529_v0, %v524_v35 }
 0x298   : > { %531 = vst [vmem:[%s956_s5] sm:$0x3] %v530_v41 }
 0x299   : > { %v625_v47 = vpop.permute.xlu1 %624 }
 0x29a   : > { %v626_v48 = vadd.f32 %v625_v47, %v620_v45 }
 0x29c   : > { %722 = vst [vmem:[%s956_s5 + $0x2] sm:$0x3] %v626_v48 }
 0x29d PF: > { %s15_s20 = sadd.s32 1, %s814_s20   ;;  %s957_s18 = smov %s810_s19 }
 0x29e   : > { %p12_p8 = scmp.ge.s32.totalorder %s15_s20, 4   ;;  %s958_s19 = smov %s960_s21 }
 0x2a0   :  { %14 = sbr.rel (!%p12_p8) target bundleno = 2 (0x2), region = 92 }

</bundles_post_ra>
